<compile_context>
chip_gen: v7x
topology: tpu7x:2x2x1
jax: 0.10.0
libtpu: 0.0.40
codegen_flags: <defaults>
</compile_context>

<pallas_src>
import jax
import jax.numpy as jnp
from jax.experimental import pallas as pl
from jax.experimental.pallas import tpu as pltpu


def _round_up(x, m):
    return (x + m - 1) // m * m


# ---------------------------------------------------------------------------
# Pallas kernel 1: fused (im2col-patches) GEMM + folded bias + ReLU
# ---------------------------------------------------------------------------
def _conv_gemm_kernel(p_ref, w_ref, o_ref):
    acc = jnp.dot(p_ref[...], w_ref[...], preferred_element_type=jnp.float32)
    o_ref[...] = jnp.maximum(acc, 0.0).astype(o_ref.dtype)


def conv_gemm_bias_relu(patches, weight, bias, *, compute_dtype=jnp.bfloat16):
    """patches: (M, K) f32, weight: (K, Cout) f32, bias: (Cout,) f32 -> (M, Cout) f32.

    Pads K (+1 bias column) and Cout to multiples of 128 (lane-dense tiles),
    pads M to the tile size, runs a single fused GEMM+bias+ReLU Pallas kernel.
    """
    M, K = patches.shape
    Kw, Cout = weight.shape
    assert K == Kw

    K_pad = _round_up(K + 1, 128)          # +1 column holds the folded bias
    Cout_pad = _round_up(Cout, 128)

    if M <= 1024:                          # whole layer in one grid step
        tm = _round_up(M, 8)
        M_pad = tm
    else:                                  # big layers: 1024-row tiles, >=2 steps
        tm = 1024
        M_pad = _round_up(M, tm)

    # Padded bf16 operands; bias folded as an extra weight row hit by a ones column.
    p = jnp.zeros((M_pad, K_pad), compute_dtype)
    p = p.at[:M, :K].set(patches.astype(compute_dtype))
    p = p.at[:, K].set(1.0)                                # bias column (padded rows sliced away)

    w = jnp.zeros((K_pad, Cout_pad), compute_dtype)
    w = w.at[:K, :Cout].set(weight.astype(compute_dtype))
    w = w.at[K, :Cout].set(bias.astype(compute_dtype))

    out = pl.pallas_call(
        _conv_gemm_kernel,
        out_shape=jax.ShapeDtypeStruct((M_pad, Cout_pad), jnp.float32),
        grid_spec=pltpu.PrefetchScalarGridSpec(
            num_scalar_prefetch=0,
            grid=(M_pad // tm,),
            in_specs=[
                pl.BlockSpec((tm, K_pad), lambda i: (i, 0)),
                pl.BlockSpec((K_pad, Cout_pad), lambda i: (0, 0)),
            ],
            out_specs=pl.BlockSpec((tm, Cout_pad), lambda i: (i, 0)),
        ),
        compiler_params=pltpu.CompilerParams(
            dimension_semantics=("parallel",),
            vmem_limit_bytes=32 * 1024 * 1024,
        ),
    )(p, w)
    return out[:M, :Cout]


# ---------------------------------------------------------------------------
# Pallas kernel 2: batched nearest-neighbour mask interp (selection matmuls)
# ---------------------------------------------------------------------------
def _mask_interp_kernel(m_ref, sh_ref, sw_ref, o_ref):
    # m_ref : (N*Hin, Win) f32   sh_ref: (N*Hout, N*Hin) block-diagonal one-hot
    # sw_ref: (Win, Wout_pad)    o_ref : (N*Hout, Wout_pad) int8
    t = jnp.dot(sh_ref[...], m_ref[...], preferred_element_type=jnp.float32)
    o = jnp.dot(t, sw_ref[...], preferred_element_type=jnp.float32)
    o_ref[...] = (o > 0.5).astype(o_ref.dtype)   # one-hot selection -> exact 0/1


def interpolate_mask_nearest(mask, out_h, out_w):
    """PyTorch F.interpolate(mask[None].float(), size=(out_h, out_w)).to(bool)[0]."""
    N, Hin, Win = mask.shape
    # Integer-exact PyTorch 'nearest' indices: src = floor(dst * in / out).
    ridx = (jnp.arange(out_h) * Hin) // out_h
    cidx = (jnp.arange(out_w) * Win) // out_w

    s_h = jax.nn.one_hot(ridx, Hin, dtype=jnp.float32)               # (out_h, Hin)
    s_h_blk = jnp.kron(jnp.eye(N, dtype=jnp.float32), s_h)           # (N*out_h, N*Hin)
    out_w_pad = _round_up(out_w, 128)                                # lane-dense output
    s_w = jnp.zeros((Win, out_w_pad), jnp.float32)
    s_w = s_w.at[cidx, jnp.arange(out_w)].set(1.0)                   # (Win, out_w_pad)

    m2 = mask.reshape(N * Hin, Win).astype(jnp.float32)

    out = pl.pallas_call(
        _mask_interp_kernel,
        out_shape=jax.ShapeDtypeStruct((N * out_h, out_w_pad), jnp.int8),
        grid_spec=pltpu.PrefetchScalarGridSpec(
            num_scalar_prefetch=0,
            grid=(1,),
            in_specs=[
                pl.BlockSpec((N * Hin, Win), lambda i: (0, 0)),
                pl.BlockSpec((N * out_h, N * Hin), lambda i: (0, 0)),
                pl.BlockSpec((Win, out_w_pad), lambda i: (0, 0)),
            ],
            out_specs=pl.BlockSpec((N * out_h, out_w_pad), lambda i: (0, 0)),
        ),
        compiler_params=pltpu.CompilerParams(dimension_semantics=("arbitrary",)),
    )(m2, s_h_blk, s_w)
    return out.reshape(N, out_h, out_w_pad)[:, :, :out_w].astype(bool)


# ---------------------------------------------------------------------------
# Plain-JAX glue: NHWC im2col (no transposes), conv layer, synthetic params
# ---------------------------------------------------------------------------
def im2col_nhwc(x, ksize=3, stride=2, pad=1):
    """x: (N, H, W, C) -> patches (N*Ho*Wo, ksize*ksize*C) in (kh, kw, c) order."""
    N, H, W, C = x.shape
    Ho = (H + 2 * pad - ksize) // stride + 1
    Wo = (W + 2 * pad - ksize) // stride + 1
    xp = jnp.pad(x, ((0, 0), (pad, pad), (pad, pad), (0, 0)))
    cols = []
    for kh in range(ksize):
        for kw in range(ksize):
            cols.append(xp[:, kh:kh + stride * Ho:stride, kw:kw + stride * Wo:stride, :])
    patches = jnp.concatenate(cols, axis=-1)           # (N, Ho, Wo, k*k*C), lane-dim concat only
    return patches.reshape(N * Ho * Wo, ksize * ksize * C), Ho, Wo


def conv_layer_nhwc(x, weight, bias, stride=2):
    """3x3 stride-2 padded conv + ReLU on NHWC activations via the Pallas GEMM."""
    N = x.shape[0]
    Cout, Cin = weight.shape[0], weight.shape[1]
    patches, Ho, Wo = im2col_nhwc(x, 3, stride, 1)
    w2 = weight.transpose(2, 3, 1, 0).reshape(9 * Cin, Cout)   # (kh, kw, c) -> matches patches
    out = conv_gemm_bias_relu(patches, w2, bias)               # (N*Ho*Wo, Cout)
    return out.reshape(N, Ho, Wo, Cout)                        # stays NHWC, no transpose


def init_backbone_params(key, in_ch=3, widths=(8, 16, 32, 64)):
    params = {}
    c = in_ch
    for i, w in enumerate(widths, start=1):
        key, k1, k2 = jax.random.split(key, 3)
        params[f"layer{i}"] = {
            "weight": jax.random.normal(k1, (w, c, 3, 3), jnp.float32) / jnp.sqrt(c * 9.0),
            "bias": 0.01 * jax.random.normal(k2, (w,), jnp.float32),
        }
        c = w
    return params


class NestedTensor:
    def __init__(self, tensors, mask):
        self.tensors = tensors
        self.mask = mask


class BackboneBase:
    """Pallas/JAX re-implementation of the PyTorch BackboneBase."""

    def __init__(self, backbone_params, train_backbone, num_channels, return_interm_layers):
        # TODO(synk): requires_grad_(False) freezing has no forward-pass effect; skipped.
        if return_interm_layers:
            self.return_layers = {"layer1": "0", "layer2": "1", "layer3": "2", "layer4": "3"}
        else:
            self.return_layers = {"layer4": "0"}
        self.params = backbone_params
        self.num_channels = num_channels

    def body(self, x_nchw):
        # IntermediateLayerGetter over a tiny synthetic ResNet-like backbone:
        # layer{1..4} = 3x3 stride-2 conv + ReLU, run as Pallas GEMMs in NHWC.
        x = x_nchw.transpose(0, 2, 3, 1)               # NCHW -> NHWC once at entry
        outs = {}
        for i in range(1, 5):
            name = f"layer{i}"
            p = self.params[name]
            x = conv_layer_nhwc(x, p["weight"], p["bias"], stride=2)
            if name in self.return_layers:
                outs[self.return_layers[name]] = x     # kept NHWC internally
        return outs

    def forward(self, tensor_list: NestedTensor):
        xs = self.body(tensor_list.tensors)
        out = {}
        for name, x in xs.items():
            m = tensor_list.mask
            assert m is not None
            mask = interpolate_mask_nearest(m, x.shape[1], x.shape[2])
            out[name] = NestedTensor(x.transpose(0, 3, 1, 2), mask)   # NHWC -> NCHW at boundary
        return out


if __name__ == "__main__":
    key = jax.random.PRNGKey(0)
    kx, kp = jax.random.split(key)

    N, C, H, W = 2, 3, 64, 64
    x = jax.random.normal(kx, (N, C, H, W), jnp.float32)

    # DETR-style padding mask: True marks padded pixels.
    valid_h = jnp.array([H, 48])
    valid_w = jnp.array([W, 40])
    hh = jnp.arange(H)[None, :, None]
    ww = jnp.arange(W)[None, None, :]
    mask = (hh >= valid_h[:, None, None]) | (ww >= valid_w[:, None, None])

    params = init_backbone_params(kp, in_ch=C, widths=(8, 16, 32, 64))
    model = BackboneBase(params, train_backbone=True, num_channels=64,
                         return_interm_layers=True)

    out = model.forward(NestedTensor(x, mask))
    for name in sorted(out):
        nt = out[name]
        jax.block_until_ready(nt.tensors)
        jax.block_until_ready(nt.mask)

    print("KERNEL_OK")
</pallas_src>

<mosaic_0001>
module attributes {stable_mosaic.version = 11 : i64} {
  func.func @_conv_gemm_kernel(%arg0: i32, %arg1: memref<1024x128xbf16, #tpu.memory_space<vmem>>, %arg2: memref<128x128xbf16, #tpu.memory_space<vmem>>, %arg3: memref<1024x128xf32, #tpu.memory_space<vmem>>) attributes {dimension_semantics = [#tpu.dimension_semantics<parallel>], iteration_bounds = array<i64: 2>, scalar_prefetch = 0 : i64, scratch_operands = 0 : i64, tpu.core_type = #tpu.core_type<tc>, window_params = [{transform_indices = @transform_0, window_bounds = array<i64: 1024, 128>}, {pipeline_mode = #tpu.pipeline_mode<synchronous>, transform_indices = @transform_1, window_bounds = array<i64: 128, 128>}, {transform_indices = @transform_2, window_bounds = array<i64: 1024, 128>}]} {
    %c0 = arith.constant 0 : index
    %c0_0 = arith.constant 0 : index
    %0 = vector.load %arg1[%c0, %c0_0] : memref<1024x128xbf16, #tpu.memory_space<vmem>>, vector<1024x128xbf16>
    %c0_1 = arith.constant 0 : index
    %c0_2 = arith.constant 0 : index
    %1 = vector.load %arg2[%c0_1, %c0_2] : memref<128x128xbf16, #tpu.memory_space<vmem>>, vector<128x128xbf16>
    %cst = arith.constant dense<0.000000e+00> : vector<1024x128xf32>
    %2 = tpu.matmul %0, %1, %cst {dimension_numbers = #tpu.dot_dimension_numbers<[1], [0], [0], [1], [0, 0, 1, 1], [], []>} : vector<1024x128xbf16>, vector<128x128xbf16>, vector<1024x128xf32> -> vector<1024x128xf32>
    %cst_3 = arith.constant 0.000000e+00 : f32
    %3 = vector.broadcast %cst_3 : f32 to vector<1024x128xf32>
    %4 = arith.maximumf %2, %3 : vector<1024x128xf32>
    %c0_4 = arith.constant 0 : index
    %c0_5 = arith.constant 0 : index
    %5 = vector.load %arg3[%c0_4, %c0_5] : memref<1024x128xf32, #tpu.memory_space<vmem>>, vector<1024x128xf32>
    tpu.vector_store %arg3[%c0_4, %c0_5], %4 {strides = array<i32>} : memref<1024x128xf32, #tpu.memory_space<vmem>>, vector<1024x128xf32>,
    return
  }
  func.func @transform_0(%arg0: i32) -> (i32, i32) {
    %c0_i32 = arith.constant 0 : i32
    %c0_i32_0 = arith.constant 0 : i32
    return %arg0, %c0_i32 : i32, i32
  }
  func.func @transform_1(%arg0: i32) -> (i32, i32) {
    %c0_i32 = arith.constant 0 : i32
    %c0_i32_0 = arith.constant 0 : i32
    %c0_i32_1 = arith.constant 0 : i32
    return %c0_i32, %c0_i32_0 : i32, i32
  }
  func.func @transform_2(%arg0: i32) -> (i32, i32) {
    %c0_i32 = arith.constant 0 : i32
    %c0_i32_0 = arith.constant 0 : i32
    return %arg0, %c0_i32 : i32, i32
  }
}

</mosaic_0001>

<bundles_post_ra>
// kernel: tpu_custom_call.1
= control target key start
LH: loop header
LB: loop body
LE: loop exit
PB: predicated region body
PF: predicated region fallthrough
CT: control target
= control target key end

     0   :  { %7 = vsyncpa [#allocation3], 0  ;;  %s2666_s0 = inlined_call_operand.hbm [shape: bf16[2048,128], index: 0, kind: input, shape index: {}]   ;;  %s2667_s1 = inlined_call_operand.hbm [shape: bf16[128,128], index: 1, kind: input, shape index: {}]   ;;  %s2668_s2 = inlined_call_operand.hbm [shape: f32[2048,128], index: 2, kind: output, shape index: {}]  }
   0x1   :  { %9 = vsyncpa [#allocation3 + $0x1], 0 }
   0x2   :  { %10 = vsyncpa [#allocation6], 0 }
   0x3   :  { %11 = vsyncpa [#allocation4], 0 }
   0x4   :  { %13 = vsyncpa [#allocation4 + $0x1], 0  ;;  %s2261_s9 = smov 0   ;;  %s2263_s10 = smov 0  }
   0x5   :  { %s2265_s11 = smov 0   ;;  %s2267_s12 = smov 0  }
   0x6 LB: > { %s2282_s13 = sadd.s32 4294967295, %s2237_s12   ;;  %s1654_s14 = sadd.s32 4294967294, %s2237_s12   ;;  %s2237_s12 = sphi %s2267_s12, %s2688_s12   ;;  %s2233_s11 = sphi %s2265_s11, %s2687_s11   ;;  %s2229_s10 = sphi %s2263_s10, %s2686_s10   ;;  %s2225_s9 = sphi %s2261_s9, %s2685_s9  }
   0x7   : > { %p39_p0 = scmp.ne.s32.totalorder %s2229_s10, %s2225_s9  ;;  %p2669_p1 = scmp.eq.s32.totalorder %s2282_s13, 0 }
   0x8   : > { %p90_p3 = scmp.eq.s32.totalorder %s1654_s14, 1  ;;  %p1655_p5 = scmp.ge.s32.totalorder %s2237_s12, 1 }
   0x9   : > { %p2291_p4 = por %p2669_p1, %p39_p0  ;;  %p97_p7 = scmp.lt.s32.totalorder %s2237_s12, 3 }
   0xa   : > { %p2296_p6 = por %p90_p3, %p39_p0  ;;  %s2239_s18 = smov [#allocation5]  }
   0xb   : > { %s2672_s15 = scalar_select %p2291_p4, 1, 0 }
   0xc   : > { %s2673_s16 = scalar_select %p2296_p6, 1, 0 }
   0xd   : > { %p2301_p8 = pnand %p1655_p5, %p97_p7  ;;  %s109_s19 = sshll.u32 %s2239_s18, 4  ;;  %s2305_s19 = int_to_ptr.vmem [resolvable:$true] %s109_s19 }
   0xe   : > { %s2317_s21 = sadd.s32 1, %s2237_s12   ;;  %s26_s22 = sadd.s32 1, %s2233_s11 }
   0xf   : > { %s2674_s17 = scalar_select %p2301_p8, 1, 0 }
  0x10   : > { %p1984_p9 = pneg %p2301_p8  ;;  %s23_s23 = ssub.s32 %s2237_s12, %s2317_s21 }
  0x11   : > { %s2109_s26 = scalar_lea.hbm %s2667_s1, 1024 }
  0x12   : > { %p2312_p11 = pnand %p1984_p9, %p2669_p1  ;;  %p2110_p12 = scmp.ne.s32.totalorder %s2667_s1, %s2109_s26 }
  0x13   : > { %p2116_p5 = scmp.lt.u32.totalorder %s2109_s26, %s2667_s1 }
  0x14   : > { %p2111_p13 = pneg %p2312_p11 }
  0x16   : > { %p2112_p0 = pnand %p2111_p13, %p2110_p12 }
  0x18   : > { %p2113_p3 = pneg %p2112_p0 }
  0x1a   : > { %p2118_p7 = pnand %p2116_p5, %p2113_p3 }
  0x1c   : > { %2121 = shalt.err (!%p2118_p7)
}
  0x1d   : > { %s2122_s3 = scalar_lea.vmem %s2305_s19, 1024  ;;  %p2130_p2 = scmp.lt.s32.totalorder %s2305_s19, %s2305_s19 }
  0x1e   : > { %p2123_p9 = scmp.ne.s32.totalorder %s2305_s19, %s2122_s3  ;;  %p2131_p6 = scmp.lt.s32.totalorder %s2122_s3, %s2122_s3 }
  0x20   : > { %p2125_p10 = pnand %p2123_p9, %p2111_p13  ;;  %p2132_p4 = por %p2131_p6, %p2130_p2 }
  0x22   : > { %p2126_p1 = pneg %p2125_p10 }
  0x24   : > { %p2133_p8 = pnand %p2132_p4, %p2126_p1 }
  0x26   : > { %2136 = shalt.err (!%p2133_p8)
}
  0x27   : > { %s2240_s4 = smov 64   ;;  %s2241_s5 = smov 4  }
  0x28   : > { %1987 = dma.hbm_to_vmem [thread:$0]  (!%p2312_p11), %s2667_s1, 1024, %s2305_s19, [#allocation6], %s2240_s4, %s2240_s4, %s2241_s5  }
  0x29   : > { %p24_p1 = scmp.eq.s32.totalorder %s23_s23, 0  ;;  %p33_p2 = scmp.ne.s32.totalorder %s2233_s11, %s2229_s10 }
  0x2a   : > { %p34_p4 = scmp.eq.s32.totalorder %s2237_s12, 0  ;;  %p1997_p6 = scmp.lt.s32.totalorder %s2237_s12, 2 }
  0x2b   : > { %s2351_s8 = scalar_select %p24_p1, %s2233_s11, %s26_s22  }
  0x2c   : > { %p35_p8 = por %p34_p4, %p33_p2  ;;  %p2676_p10 = scmp.eq.s32.totalorder %s2282_s13, 1 }
  0x2d   : > { %s123_s18 = sand.u32 1, %s2233_s11   ;;  %s1742_s20 = sshll.u32 %s2237_s12, 13 }
  0x2e   : > { %p2355_p12 = por %p2676_p10, %p33_p2  ;;  %s1658_s24 = sshll.u32 %s123_s18, 9 }
  0x2f   : > { %s2364_s27 = scalar_lea.hbm %s2666_s0, %s1742_s20  ;;  %s127_s19 = scalar_lea.vmem [#allocation2], %s1658_s24 }
  0x30   : > { %s134_s22 = sshll.u32 %s127_s19, 4  ;;  %p2366_p11 = pnand %p1997_p6, %p35_p8  ;;  %s2370_s22 = int_to_ptr.vmem [resolvable:$true] %s134_s22 }
  0x31   : > { %s2372_s28 = scalar_lea.sflag [#allocation3], %s123_s18  ;;  %s2137_s29 = scalar_lea.hbm %s2364_s27, 8192 }
  0x32   : > { %p2138_p13 = scmp.ne.s32.totalorder %s2364_s27, %s2137_s29  ;;  %p2139_p0 = pneg %p2366_p11 }
  0x33   : > { %s2142_s6 = scalar_lea.hbm %s2666_s0, 16384  ;;  %p2143_p7 = scmp.lt.u32.totalorder %s2364_s27, %s2666_s0 }
  0x34   : > { %p2140_p3 = pnand %p2139_p0, %p2138_p13  ;;  %p2144_p9 = scmp.lt.u32.totalorder %s2142_s6, %s2137_s29 }
  0x35   : > { %p2146_p2 = scmp.lt.u32.totalorder %s2137_s29, %s2364_s27 }
  0x36   : > { %p2141_p5 = pneg %p2140_p3  ;;  %p2145_p1 = por %p2144_p9, %p2143_p7 }
  0x38   : > { %p2147_p4 = por %p2146_p2, %p2145_p1 }
  0x3a   : > { %p2148_p6 = pnand %p2147_p4, %p2141_p5 }
  0x3c   : > { %2151 = shalt.err (!%p2148_p6)
}
  0x3d   : > { %s2152_s18 = scalar_lea.vmem %s2370_s22, 8192  ;;  %s2242_s24 = smov [#allocation2]  }
  0x3e   : > { %p2153_p8 = scmp.ne.s32.totalorder %s2370_s22, %s2152_s18  ;;  %s2157_s25 = sshll.u32 %s2242_s24, 4  ;;  %s2158_s25 = int_to_ptr.vmem [resolvable:$false] %s2157_s25 }
  0x3f   : > { %s2159_s26 = scalar_lea.vmem %s2158_s25, 16384  ;;  %p2160_p3 = scmp.lt.s32.totalorder %s2370_s22, %s2158_s25 }
  0x40   : > { %p2155_p10 = pnand %p2153_p8, %p2139_p0  ;;  %p2161_p7 = scmp.lt.s32.totalorder %s2159_s26, %s2152_s18 }
  0x42   : > { %p2156_p13 = pneg %p2155_p10  ;;  %p2162_p9 = por %p2161_p7, %p2160_p3 }
  0x44   : > { %p2163_p1 = pnand %p2162_p9, %p2156_p13 }
  0x46   : > { %2166 = shalt.err (!%p2163_p1)
}
  0x47   : > { %1991 = dma.hbm_to_vmem [thread:$0]  (!%p2366_p11), %s2364_s27, 8192, %s2370_s22, %s2372_s28, %s2240_s4, %s2240_s4, %s2241_s5  }
  0x48   : > { %p2679_p0 = scmp.ne.s32.totalorder %s2674_s17, 0 }
  0x49   : > { %s2406_s19 = sand.u32 (!%p2679_p0), 1, %s2229_s10   ;;  %p2680_p5 = scmp.ne.s32.totalorder (!%p2679_p0), %s2672_s15, 0 }
  0x4a   : > { %146 = sbr.rel (%p2679_p0) target bundleno = 470 (0x1d6), region = 28  ;;  %s1662_s29 = sshll.u32 (!%p2679_p0), %s2406_s19, 9 }
  0x4b   : > { %s149_s30 = scalar_lea.sflag (!%p2679_p0), [#allocation3], %s2406_s19  ;;  %s2410_s3 = scalar_lea.vmem (!%p2679_p0), [#allocation2], %s1662_s29 }
  0x51   : > { %2212 = dma.done.wait (%p2680_p5), %s149_s30, 8192  }
  0x52   : > { %2214 = vsyncadd (%p2680_p5), %s149_s30, 4294959104  ;;  %p2681_p11 = scmp.eq.s32.totalorder %s2282_s13, 0 }
  0x54   : > { %2216 = dma.done.wait (%p2681_p11), [#allocation6], 1024   ;;  %p2682_p2 = pmov %p2681_p11 }
  0x55   : > { %v2037_v0 = vld [vmem:[#allocation5] sm:$0xff]   ;;  %v2038_v1 = vld [vmem:[#allocation5 + $0x8] sm:$0xff]   ;;  %v2039_v2 = vld [vmem:[#allocation5 + $0x10] sm:$0xff]   ;;  %s1664_s15 = sshll.u32 %s2406_s19, 10  ;;  %s1743_s4 = sshll.u32 %s2282_s13, 14 }
  0x56   : > { %2218 = vsyncadd (%p2682_p2), [#allocation6], 4294966272  ;;  %1816 = vmatprep.subr.bf16.mxu0 %v2037_v0  ;;  %1960 = vmatprep.subr.bf16.mxu1 %v2037_v0  ;;  %v2040_v3 = vld [vmem:[#allocation5 + $0x18] sm:$0xff]   ;;  %v2045_v4 = vld [vmem:[%s2410_s3] sm:$0xff]   ;;  %s2485_s17 = scalar_lea.vmem [#allocation7], %s1664_s15  ;;  %s2614_s22 = scalar_lea.hbm %s2668_s2, %s1743_s4 }
  0x57   : > { %1817 = vmatpush3.bf16.msra.mxu0 %v2037_v0  ;;  %1968 = vmatpush3.bf16.msra.mxu1 %v2037_v0  ;;  %v2046_v5 = vld [vmem:[%s2410_s3 + $0x100] sm:$0xff]   ;;  %v2042_v7 = vld [vmem:[#allocation5 + $0x28] sm:$0xff]   ;;  %v2043_v8 = vld [vmem:[#allocation5 + $0x30] sm:$0xff]   ;;  %s1571_s5 = sshll.u32 %s2485_s17, 4  ;;  %s1558_s23 = scalar_lea.sflag [#allocation4], %s2406_s19  ;;  %s2616_s5 = int_to_ptr.vmem [resolvable:$true] %s1571_s5 }
  0x58   : > { %1818 = vmatprep.subr.bf16.mxu0 %v2038_v1  ;;  %1961 = vmatprep.subr.bf16.mxu1 %v2038_v1  ;;  %v2041_v6 = vld [vmem:[#allocation5 + $0x20] sm:$0xff]   ;;  %v2044_v9 = vld [vmem:[#allocation5 + $0x38] sm:$0xff]   ;;  %v2047_v10 = vld [vmem:[%s2410_s3 + $0x8] sm:$0xff]   ;;  %s2167_s28 = scalar_lea.vmem %s2616_s5, 16384  ;;  %s2243_s6 = smov [#allocation7]  }
  0x59   : > { %1832 = vmatprep.mubr.bf16.mxu0 %v2045_v4  ;;  %1896 = vmatprep.mubr.bf16.mxu1 %v2046_v5  ;;  %v2048_v11 = vld [vmem:[%s2410_s3 + $0x108] sm:$0xff]   ;;  %v2049_v12 = vld [vmem:[%s2410_s3 + $0x10] sm:$0xff]   ;;  %v2051_v14 = vld [vmem:[%s2410_s3 + $0x18] sm:$0xff]   ;;  %p2168_p4 = scmp.ne.s32.totalorder %s2616_s5, %s2167_s28  ;;  %s2171_s7 = sshll.u32 %s2243_s6, 4  ;;  %s2172_s7 = int_to_ptr.vmem [resolvable:$false] %s2171_s7 }
  0x5a   : > { %v2050_v13 = vld [vmem:[%s2410_s3 + $0x110] sm:$0xff]   ;;  %v2052_v15 = vld [vmem:[%s2410_s3 + $0x118] sm:$0xff]   ;;  %v2053_v16 = vld [vmem:[%s2410_s3 + $0x20] sm:$0xff]   ;;  %s2173_s20 = scalar_lea.vmem %s2172_s7, 32768  ;;  %p2174_p10 = scmp.lt.s32.totalorder %s2616_s5, %s2172_s7 }
  0x5b   : > { %1819 = vmatpush3.bf16.msra.mxu0 %v2038_v1  ;;  %1969 = vmatpush3.bf16.msra.mxu1 %v2038_v1  ;;  %v2054_v17 = vld [vmem:[%s2410_s3 + $0x120] sm:$0xff]   ;;  %v2055_v18 = vld [vmem:[%s2410_s3 + $0x28] sm:$0xff]   ;;  %v2057_v20 = vld [vmem:[%s2410_s3 + $0x30] sm:$0xff]   ;;  %p2169_p6 = pnand %p2168_p4, %p2355_p12  ;;  %p2175_p13 = scmp.lt.s32.totalorder %s2173_s20, %s2167_s28 }
  0x5c   : > { %1820 = vmatprep.subr.bf16.mxu0 %v2039_v2  ;;  %1962 = vmatprep.subr.bf16.mxu1 %v2039_v2  ;;  %v2056_v19 = vld [vmem:[%s2410_s3 + $0x128] sm:$0xff]   ;;  %v2058_v21 = vld [vmem:[%s2410_s3 + $0x130] sm:$0xff]   ;;  %v2059_v22 = vld [vmem:[%s2410_s3 + $0x38] sm:$0xff]  }
  0x5d   : > { %v2060_v23 = vld [vmem:[%s2410_s3 + $0x138] sm:$0xff]   ;;  %v2061_v24 = vld [vmem:[%s2410_s3 + $0x40] sm:$0xff]   ;;  %v2063_v26 = vld [vmem:[%s2410_s3 + $0x48] sm:$0xff]   ;;  %p2170_p8 = pneg %p2169_p6  ;;  %p2176_p3 = por %p2175_p13, %p2174_p10 }
  0x5e   : > { %v2062_v25 = vld [vmem:[%s2410_s3 + $0x140] sm:$0xff]   ;;  %v2064_v27 = vld [vmem:[%s2410_s3 + $0x148] sm:$0xff]   ;;  %v2065_v28 = vld [vmem:[%s2410_s3 + $0x50] sm:$0xff]  }
  0x5f   : > { %1821 = vmatpush3.bf16.msra.mxu0 %v2039_v2  ;;  %1970 = vmatpush3.bf16.msra.mxu1 %v2039_v2  ;;  %v2066_v29 = vld [vmem:[%s2410_s3 + $0x150] sm:$0xff]   ;;  %v2067_v30 = vld [vmem:[%s2410_s3 + $0x58] sm:$0xff]   ;;  %v2069_v32 = vld [vmem:[%s2410_s3 + $0x60] sm:$0xff]   ;;  %p2177_p7 = pnand %p2176_p3, %p2170_p8 }
  0x60   : > { %1822 = vmatprep.subr.bf16.mxu0 %v2040_v3  ;;  %1963 = vmatprep.subr.bf16.mxu1 %v2040_v3  ;;  %v2068_v31 = vld [vmem:[%s2410_s3 + $0x158] sm:$0xff]   ;;  %v2070_v33 = vld [vmem:[%s2410_s3 + $0x160] sm:$0xff]   ;;  %v2071_v34 = vld [vmem:[%s2410_s3 + $0x68] sm:$0xff]  }
  0x61   : > { %v2072_v35 = vld [vmem:[%s2410_s3 + $0x168] sm:$0xff]   ;;  %v2073_v36 = vld [vmem:[%s2410_s3 + $0x70] sm:$0xff]   ;;  %v2075_v38 = vld [vmem:[%s2410_s3 + $0x78] sm:$0xff]  }
  0x62   : > { %v2074_v37 = vld [vmem:[%s2410_s3 + $0x170] sm:$0xff]   ;;  %v2076_v39 = vld [vmem:[%s2410_s3 + $0x178] sm:$0xff]   ;;  %v2077_v40 = vld [vmem:[%s2410_s3 + $0x80] sm:$0xff]  }
  0x63   : > { %1823 = vmatpush3.bf16.msra.mxu0 %v2040_v3  ;;  %1971 = vmatpush3.bf16.msra.mxu1 %v2040_v3  ;;  %v2078_v41 = vld [vmem:[%s2410_s3 + $0x180] sm:$0xff]   ;;  %v2079_v42 = vld [vmem:[%s2410_s3 + $0x88] sm:$0xff]   ;;  %v2081_v44 = vld [vmem:[%s2410_s3 + $0x90] sm:$0xff]  }
  0x64   : > { %1824 = vmatprep.subr.bf16.mxu0 %v2041_v6  ;;  %1964 = vmatprep.subr.bf16.mxu1 %v2041_v6  ;;  %v2080_v43 = vld [vmem:[%s2410_s3 + $0x188] sm:$0xff]   ;;  %v2082_v45 = vld [vmem:[%s2410_s3 + $0x190] sm:$0xff]   ;;  %v2083_v46 = vld [vmem:[%s2410_s3 + $0x98] sm:$0xff]  }
  0x65   : > { %v2084_v47 = vld [vmem:[%s2410_s3 + $0x198] sm:$0xff]   ;;  %v2085_v48 = vld [vmem:[%s2410_s3 + $0xa0] sm:$0xff]   ;;  %v2087_v50 = vld [vmem:[%s2410_s3 + $0xa8] sm:$0xff]  }
  0x66   : > { %v2086_v49 = vld [vmem:[%s2410_s3 + $0x1a0] sm:$0xff]   ;;  %v2088_v51 = vld [vmem:[%s2410_s3 + $0x1a8] sm:$0xff]   ;;  %v2089_v52 = vld [vmem:[%s2410_s3 + $0xb0] sm:$0xff]  }
  0x67   : > { %1825 = vmatpush3.bf16.msra.mxu0 %v2041_v6  ;;  %1972 = vmatpush3.bf16.msra.mxu1 %v2041_v6  ;;  %v2090_v53 = vld [vmem:[%s2410_s3 + $0x1b0] sm:$0xff]   ;;  %v2091_v54 = vld [vmem:[%s2410_s3 + $0xb8] sm:$0xff]   ;;  %v2093_v56 = vld [vmem:[%s2410_s3 + $0xc0] sm:$0xff]  }
  0x68   : > { %1826 = vmatprep.subr.bf16.mxu0 %v2042_v7  ;;  %1965 = vmatprep.subr.bf16.mxu1 %v2042_v7  ;;  %v2092_v55 = vld [vmem:[%s2410_s3 + $0x1b8] sm:$0xff]   ;;  %v2094_v57 = vld [vmem:[%s2410_s3 + $0x1c0] sm:$0xff]   ;;  %v2095_v58 = vld [vmem:[%s2410_s3 + $0xc8] sm:$0xff]  }
  0x69   : > { %v2096_v59 = vld [vmem:[%s2410_s3 + $0x1c8] sm:$0xff]   ;;  %v2097_v60 = vld [vmem:[%s2410_s3 + $0xd0] sm:$0xff]   ;;  %v2099_v62 = vld [vmem:[%s2410_s3 + $0xd8] sm:$0xff]  }
  0x6a   : > { %v2098_v61 = vld [vmem:[%s2410_s3 + $0x1d0] sm:$0xff]   ;;  %v2100_v63 = vld [vmem:[%s2410_s3 + $0x1d8] sm:$0xff]   ;;  %v2101_v0 = vld [vmem:[%s2410_s3 + $0xe0] sm:$0xff]  }
  0x6b   : > { %1827 = vmatpush3.bf16.msra.mxu0 %v2042_v7  ;;  %1973 = vmatpush3.bf16.msra.mxu1 %v2042_v7  ;;  %v2102_v1 = vld [vmem:[%s2410_s3 + $0x1e0] sm:$0xff]   ;;  %v2103_v2 = vld [vmem:[%s2410_s3 + $0xe8] sm:$0xff]   ;;  %v2105_v4 = vld [vmem:[%s2410_s3 + $0xf0] sm:$0xff]  }
  0x6c   : > { %1828 = vmatprep.subr.bf16.mxu0 %v2043_v8  ;;  %1966 = vmatprep.subr.bf16.mxu1 %v2043_v8  ;;  %v2104_v3 = vld [vmem:[%s2410_s3 + $0x1e8] sm:$0xff]   ;;  %v2106_v5 = vld [vmem:[%s2410_s3 + $0x1f0] sm:$0xff]   ;;  %v2107_v6 = vld [vmem:[%s2410_s3 + $0xf8] sm:$0xff]  }
  0x6d   : > { %v2108_v7 = vld [vmem:[%s2410_s3 + $0x1f8] sm:$0xff]  }
  0x6f   : > { %1829 = vmatpush3.bf16.msra.mxu0 %v2043_v8  ;;  %1974 = vmatpush3.bf16.msra.mxu1 %v2043_v8 }
  0x70   : > { %1830 = vmatprep.subr.bf16.mxu0 %v2044_v9  ;;  %1967 = vmatprep.subr.bf16.mxu1 %v2044_v9 }
  0x73   : > { %1831 = vmatpush3.bf16.msra.mxu0 %v2044_v9  ;;  %1975 = vmatpush3.bf16.msra.mxu1 %v2044_v9 }
  0x76   : > { %1833 = vmatmul.mubr.bf16.vlgmr.msra.gmra.mrb[0].mxu0 %v2047_v10  ;;  %1897 = vmatmul.mubr.bf16.vlgmr.msra.gmra.mrb[0].mxu1 %v2048_v11 }
  0x77   : > { %1836 = vmatprep.mubr.bf16.mxu0 %v2049_v12  ;;  %1900 = vmatprep.mubr.bf16.mxu1 %v2050_v13 }
  0x7e   : > { %1837 = vmatmul.mubr.bf16.gmra.mrb[4].mxu0 %v2051_v14  ;;  %1901 = vmatmul.mubr.bf16.gmra.mrb[4].mxu1 %v2052_v15 }
  0x7f   : > { %1840 = vmatprep.mubr.bf16.mxu0 %v2053_v16  ;;  %1904 = vmatprep.mubr.bf16.mxu1 %v2054_v17 }
  0x86   : > { %1841 = vmatmul.mubr.bf16.gmra.mrb[8].mxu0 %v2055_v18  ;;  %1905 = vmatmul.mubr.bf16.gmra.mrb[8].mxu1 %v2056_v19 }
  0x87   : > { %1844 = vmatprep.mubr.bf16.mxu0 %v2057_v20  ;;  %1908 = vmatprep.mubr.bf16.mxu1 %v2058_v21 }
  0x8e   : > { %1845 = vmatmul.mubr.bf16.gmra.mrb[12].mxu0 %v2059_v22  ;;  %1909 = vmatmul.mubr.bf16.gmra.mrb[12].mxu1 %v2060_v23 }
  0x8f   : > { %1848 = vmatprep.mubr.bf16.mxu0 %v2061_v24  ;;  %1912 = vmatprep.mubr.bf16.mxu1 %v2062_v25 }
  0x96   : > { %1849 = vmatmul.mubr.bf16.gmra.mrb[16].mxu0 %v2063_v26  ;;  %1913 = vmatmul.mubr.bf16.gmra.mrb[16].mxu1 %v2064_v27 }
  0x97   : > { %1852 = vmatprep.mubr.bf16.mxu0 %v2065_v28  ;;  %1916 = vmatprep.mubr.bf16.mxu1 %v2066_v29 }
  0x9e   : > { %1853 = vmatmul.mubr.bf16.gmra.mrb[20].mxu0 %v2067_v30  ;;  %1917 = vmatmul.mubr.bf16.gmra.mrb[20].mxu1 %v2068_v31 }
  0x9f   : > { %1856 = vmatprep.mubr.bf16.mxu0 %v2069_v32  ;;  %1920 = vmatprep.mubr.bf16.mxu1 %v2070_v33 }
  0xa6   : > { %1857 = vmatmul.mubr.bf16.gmra.mrb[24].mxu0 %v2071_v34  ;;  %1921 = vmatmul.mubr.bf16.gmra.mrb[24].mxu1 %v2072_v35 }
  0xa7   : > { %1860 = vmatprep.mubr.bf16.mxu0 %v2073_v36  ;;  %1924 = vmatprep.mubr.bf16.mxu1 %v2074_v37 }
  0xae   : > { %1861 = vmatmul.mubr.bf16.gmra.mrb[28].mxu0 %v2075_v38  ;;  %1925 = vmatmul.mubr.bf16.gmra.mrb[28].mxu1 %v2076_v39 }
  0xaf   : > { %1864 = vmatprep.mubr.bf16.mxu0 %v2077_v40  ;;  %1928 = vmatprep.mubr.bf16.mxu1 %v2078_v41 }
  0xb6   : > { %1865 = vmatmul.mubr.bf16.gmra.mrb[32].mxu0 %v2079_v42  ;;  %1929 = vmatmul.mubr.bf16.gmra.mrb[32].mxu1 %v2080_v43 }
  0xb7   : > { %1868 = vmatprep.mubr.bf16.mxu0 %v2081_v44  ;;  %1932 = vmatprep.mubr.bf16.mxu1 %v2082_v45 }
  0xbe   : > { %1869 = vmatmul.mubr.bf16.gmra.mrb[36].mxu0 %v2083_v46  ;;  %1933 = vmatmul.mubr.bf16.gmra.mrb[36].mxu1 %v2084_v47 }
  0xbf   : > { %1872 = vmatprep.mubr.bf16.mxu0 %v2085_v48  ;;  %1936 = vmatprep.mubr.bf16.mxu1 %v2086_v49 }
  0xc6   : > { %1873 = vmatmul.mubr.bf16.gmra.mrb[40].mxu0 %v2087_v50  ;;  %1937 = vmatmul.mubr.bf16.gmra.mrb[40].mxu1 %v2088_v51 }
  0xc7   : > { %1876 = vmatprep.mubr.bf16.mxu0 %v2089_v52  ;;  %1940 = vmatprep.mubr.bf16.mxu1 %v2090_v53 }
  0xce   : > { %1877 = vmatmul.mubr.bf16.gmra.mrb[44].mxu0 %v2091_v54  ;;  %1941 = vmatmul.mubr.bf16.gmra.mrb[44].mxu1 %v2092_v55 }
  0xcf   : > { %1880 = vmatprep.mubr.bf16.mxu0 %v2093_v56  ;;  %1944 = vmatprep.mubr.bf16.mxu1 %v2094_v57 }
  0xd6   : > { %1881 = vmatmul.mubr.bf16.gmra.mrb[48].mxu0 %v2095_v58  ;;  %1945 = vmatmul.mubr.bf16.gmra.mrb[48].mxu1 %v2096_v59 }
  0xd7   : > { %1884 = vmatprep.mubr.bf16.mxu0 %v2097_v60  ;;  %1948 = vmatprep.mubr.bf16.mxu1 %v2098_v61 }
  0xde   : > { %1885 = vmatmul.mubr.bf16.gmra.mrb[52].mxu0 %v2099_v62  ;;  %1949 = vmatmul.mubr.bf16.gmra.mrb[52].mxu1 %v2100_v63 }
  0xdf   : > { %1888 = vmatprep.mubr.bf16.mxu0 %v2101_v0  ;;  %1952 = vmatprep.mubr.bf16.mxu1 %v2102_v1 }
  0xe6   : > { %1889 = vmatmul.mubr.bf16.gmra.mrb[56].mxu0 %v2103_v2  ;;  %1953 = vmatmul.mubr.bf16.gmra.mrb[56].mxu1 %v2104_v3 }
  0xe7   : > { %1892 = vmatprep.mubr.bf16.mxu0 %v2105_v4  ;;  %1956 = vmatprep.mubr.bf16.mxu1 %v2106_v5 }
  0xee   : > { %1893 = vmatmul.mubr.bf16.gmra.mrb[60].mxu0 %v2107_v6  ;;  %1957 = vmatmul.mubr.bf16.gmra.mrb[60].mxu1 %v2108_v7 }
 0x149   : > { %v1834_v8 = vpop.f32.mrb[0].mxu0  ;;  %v1898_v9 = vpop.f32.mrb[0].mxu1 }
 0x14a   : > { %v1303_v10 = vmax.f32 %v1834_v8, 0.0  ;;  %v1367_v11 = vmax.f32 %v1898_v9, 0.0  ;;  %v790_v12 = vpop.f32.mrb[1].mxu0  ;;  %v1046_v13 = vpop.f32.mrb[1].mxu1 }
 0x14b   : > { %v1301_v14 = vmax.f32 %v790_v12, 0.0  ;;  %v1365_v15 = vmax.f32 %v1046_v13, 0.0  ;;  %v1835_v16 = vpop.f32.mrb[2].mxu0  ;;  %v1899_v17 = vpop.f32.mrb[2].mxu1 }
 0x14c   : > { %1431 = vst [vmem:[%s2485_s17 + $0x10] sm:$0xff] %v1303_v10  ;;  %1495 = vst [vmem:[%s2485_s17 + $0x210] sm:$0xff] %v1367_v11  ;;  %v1304_v18 = vmax.f32 %v1835_v16, 0.0  ;;  %v1368_v19 = vmax.f32 %v1899_v17, 0.0  ;;  %v793_v20 = vpop.f32.mrb[3].mxu0  ;;  %v1049_v21 = vpop.f32.mrb[3].mxu1 }
 0x14d   : > { %1429 = vst [vmem:[%s2485_s17] sm:$0xff] %v1301_v14  ;;  %1493 = vst [vmem:[%s2485_s17 + $0x200] sm:$0xff] %v1365_v15  ;;  %v1302_v22 = vmax.f32 %v793_v20, 0.0  ;;  %v1366_v23 = vmax.f32 %v1049_v21, 0.0 }
 0x14e   : > { %1432 = vst [vmem:[%s2485_s17 + $0x18] sm:$0xff] %v1304_v18  ;;  %1496 = vst [vmem:[%s2485_s17 + $0x218] sm:$0xff] %v1368_v19 }
 0x14f   : > { %1430 = vst [vmem:[%s2485_s17 + $0x8] sm:$0xff] %v1302_v22  ;;  %1494 = vst [vmem:[%s2485_s17 + $0x208] sm:$0xff] %v1366_v23 }
 0x151   : > { %v1838_v24 = vpop.f32.mrb[4].mxu0  ;;  %v1902_v25 = vpop.f32.mrb[4].mxu1 }
 0x152   : > { %v1307_v26 = vmax.f32 %v1838_v24, 0.0  ;;  %v1371_v27 = vmax.f32 %v1902_v25, 0.0  ;;  %v806_v28 = vpop.f32.mrb[5].mxu0  ;;  %v1062_v29 = vpop.f32.mrb[5].mxu1 }
 0x153   : > { %v1305_v30 = vmax.f32 %v806_v28, 0.0  ;;  %v1369_v31 = vmax.f32 %v1062_v29, 0.0  ;;  %v1839_v32 = vpop.f32.mrb[6].mxu0  ;;  %v1903_v33 = vpop.f32.mrb[6].mxu1 }
 0x154   : > { %1435 = vst [vmem:[%s2485_s17 + $0x30] sm:$0xff] %v1307_v26  ;;  %1499 = vst [vmem:[%s2485_s17 + $0x230] sm:$0xff] %v1371_v27  ;;  %v1308_v34 = vmax.f32 %v1839_v32, 0.0  ;;  %v1372_v35 = vmax.f32 %v1903_v33, 0.0  ;;  %v809_v36 = vpop.f32.mrb[7].mxu0  ;;  %v1065_v37 = vpop.f32.mrb[7].mxu1 }
 0x155   : > { %1433 = vst [vmem:[%s2485_s17 + $0x20] sm:$0xff] %v1305_v30  ;;  %1497 = vst [vmem:[%s2485_s17 + $0x220] sm:$0xff] %v1369_v31  ;;  %v1306_v38 = vmax.f32 %v809_v36, 0.0  ;;  %v1370_v39 = vmax.f32 %v1065_v37, 0.0 }
 0x156   : > { %1436 = vst [vmem:[%s2485_s17 + $0x38] sm:$0xff] %v1308_v34  ;;  %1500 = vst [vmem:[%s2485_s17 + $0x238] sm:$0xff] %v1372_v35 }
 0x157   : > { %1434 = vst [vmem:[%s2485_s17 + $0x28] sm:$0xff] %v1306_v38  ;;  %1498 = vst [vmem:[%s2485_s17 + $0x228] sm:$0xff] %v1370_v39 }
 0x159   : > { %v1842_v40 = vpop.f32.mrb[8].mxu0  ;;  %v1906_v41 = vpop.f32.mrb[8].mxu1 }
 0x15a   : > { %v1311_v42 = vmax.f32 %v1842_v40, 0.0  ;;  %v1375_v43 = vmax.f32 %v1906_v41, 0.0  ;;  %v822_v44 = vpop.f32.mrb[9].mxu0  ;;  %v1078_v45 = vpop.f32.mrb[9].mxu1 }
 0x15b   : > { %v1309_v46 = vmax.f32 %v822_v44, 0.0  ;;  %v1373_v47 = vmax.f32 %v1078_v45, 0.0  ;;  %v1843_v48 = vpop.f32.mrb[10].mxu0  ;;  %v1907_v49 = vpop.f32.mrb[10].mxu1 }
 0x15c   : > { %1439 = vst [vmem:[%s2485_s17 + $0x50] sm:$0xff] %v1311_v42  ;;  %1503 = vst [vmem:[%s2485_s17 + $0x250] sm:$0xff] %v1375_v43  ;;  %v1312_v50 = vmax.f32 %v1843_v48, 0.0  ;;  %v1376_v51 = vmax.f32 %v1907_v49, 0.0  ;;  %v825_v52 = vpop.f32.mrb[11].mxu0  ;;  %v1081_v53 = vpop.f32.mrb[11].mxu1 }
 0x15d   : > { %1437 = vst [vmem:[%s2485_s17 + $0x40] sm:$0xff] %v1309_v46  ;;  %1501 = vst [vmem:[%s2485_s17 + $0x240] sm:$0xff] %v1373_v47  ;;  %v1310_v54 = vmax.f32 %v825_v52, 0.0  ;;  %v1374_v55 = vmax.f32 %v1081_v53, 0.0 }
 0x15e   : > { %1440 = vst [vmem:[%s2485_s17 + $0x58] sm:$0xff] %v1312_v50  ;;  %1504 = vst [vmem:[%s2485_s17 + $0x258] sm:$0xff] %v1376_v51 }
 0x15f   : > { %1438 = vst [vmem:[%s2485_s17 + $0x48] sm:$0xff] %v1310_v54  ;;  %1502 = vst [vmem:[%s2485_s17 + $0x248] sm:$0xff] %v1374_v55 }
 0x161   : > { %v1846_v56 = vpop.f32.mrb[12].mxu0  ;;  %v1910_v57 = vpop.f32.mrb[12].mxu1 }
 0x162   : > { %v1315_v58 = vmax.f32 %v1846_v56, 0.0  ;;  %v1379_v59 = vmax.f32 %v1910_v57, 0.0  ;;  %v838_v60 = vpop.f32.mrb[13].mxu0  ;;  %v1094_v61 = vpop.f32.mrb[13].mxu1 }
 0x163   : > { %v1313_v62 = vmax.f32 %v838_v60, 0.0  ;;  %v1377_v63 = vmax.f32 %v1094_v61, 0.0  ;;  %v1847_v0 = vpop.f32.mrb[14].mxu0  ;;  %v1911_v1 = vpop.f32.mrb[14].mxu1 }
 0x164   : > { %1443 = vst [vmem:[%s2485_s17 + $0x70] sm:$0xff] %v1315_v58  ;;  %1507 = vst [vmem:[%s2485_s17 + $0x270] sm:$0xff] %v1379_v59  ;;  %v1316_v2 = vmax.f32 %v1847_v0, 0.0  ;;  %v1380_v3 = vmax.f32 %v1911_v1, 0.0  ;;  %v841_v4 = vpop.f32.mrb[15].mxu0  ;;  %v1097_v5 = vpop.f32.mrb[15].mxu1 }
 0x165   : > { %1441 = vst [vmem:[%s2485_s17 + $0x60] sm:$0xff] %v1313_v62  ;;  %1505 = vst [vmem:[%s2485_s17 + $0x260] sm:$0xff] %v1377_v63  ;;  %v1314_v6 = vmax.f32 %v841_v4, 0.0  ;;  %v1378_v7 = vmax.f32 %v1097_v5, 0.0 }
 0x166   : > { %1444 = vst [vmem:[%s2485_s17 + $0x78] sm:$0xff] %v1316_v2  ;;  %1508 = vst [vmem:[%s2485_s17 + $0x278] sm:$0xff] %v1380_v3 }
 0x167   : > { %1442 = vst [vmem:[%s2485_s17 + $0x68] sm:$0xff] %v1314_v6  ;;  %1506 = vst [vmem:[%s2485_s17 + $0x268] sm:$0xff] %v1378_v7 }
 0x169   : > { %v1850_v8 = vpop.f32.mrb[16].mxu0  ;;  %v1914_v9 = vpop.f32.mrb[16].mxu1 }
 0x16a   : > { %v1319_v10 = vmax.f32 %v1850_v8, 0.0  ;;  %v1383_v11 = vmax.f32 %v1914_v9, 0.0  ;;  %v854_v12 = vpop.f32.mrb[17].mxu0  ;;  %v1110_v13 = vpop.f32.mrb[17].mxu1 }
 0x16b   : > { %v1317_v14 = vmax.f32 %v854_v12, 0.0  ;;  %v1381_v15 = vmax.f32 %v1110_v13, 0.0  ;;  %v1851_v16 = vpop.f32.mrb[18].mxu0  ;;  %v1915_v17 = vpop.f32.mrb[18].mxu1 }
 0x16c   : > { %1447 = vst [vmem:[%s2485_s17 + $0x90] sm:$0xff] %v1319_v10  ;;  %1511 = vst [vmem:[%s2485_s17 + $0x290] sm:$0xff] %v1383_v11  ;;  %v1320_v18 = vmax.f32 %v1851_v16, 0.0  ;;  %v1384_v19 = vmax.f32 %v1915_v17, 0.0  ;;  %v857_v20 = vpop.f32.mrb[19].mxu0  ;;  %v1113_v21 = vpop.f32.mrb[19].mxu1 }
 0x16d   : > { %1445 = vst [vmem:[%s2485_s17 + $0x80] sm:$0xff] %v1317_v14  ;;  %1509 = vst [vmem:[%s2485_s17 + $0x280] sm:$0xff] %v1381_v15  ;;  %v1318_v22 = vmax.f32 %v857_v20, 0.0  ;;  %v1382_v23 = vmax.f32 %v1113_v21, 0.0 }
 0x16e   : > { %1448 = vst [vmem:[%s2485_s17 + $0x98] sm:$0xff] %v1320_v18  ;;  %1512 = vst [vmem:[%s2485_s17 + $0x298] sm:$0xff] %v1384_v19 }
 0x16f   : > { %1446 = vst [vmem:[%s2485_s17 + $0x88] sm:$0xff] %v1318_v22  ;;  %1510 = vst [vmem:[%s2485_s17 + $0x288] sm:$0xff] %v1382_v23 }
 0x171   : > { %v1854_v24 = vpop.f32.mrb[20].mxu0  ;;  %v1918_v25 = vpop.f32.mrb[20].mxu1 }
 0x172   : > { %v1323_v26 = vmax.f32 %v1854_v24, 0.0  ;;  %v1387_v27 = vmax.f32 %v1918_v25, 0.0  ;;  %v870_v28 = vpop.f32.mrb[21].mxu0  ;;  %v1126_v29 = vpop.f32.mrb[21].mxu1 }
 0x173   : > { %v1321_v30 = vmax.f32 %v870_v28, 0.0  ;;  %v1385_v31 = vmax.f32 %v1126_v29, 0.0  ;;  %v1855_v32 = vpop.f32.mrb[22].mxu0  ;;  %v1919_v33 = vpop.f32.mrb[22].mxu1 }
 0x174   : > { %1451 = vst [vmem:[%s2485_s17 + $0xb0] sm:$0xff] %v1323_v26  ;;  %1515 = vst [vmem:[%s2485_s17 + $0x2b0] sm:$0xff] %v1387_v27  ;;  %v1324_v34 = vmax.f32 %v1855_v32, 0.0  ;;  %v1388_v35 = vmax.f32 %v1919_v33, 0.0  ;;  %v873_v36 = vpop.f32.mrb[23].mxu0  ;;  %v1129_v37 = vpop.f32.mrb[23].mxu1 }
 0x175   : > { %1449 = vst [vmem:[%s2485_s17 + $0xa0] sm:$0xff] %v1321_v30  ;;  %1513 = vst [vmem:[%s2485_s17 + $0x2a0] sm:$0xff] %v1385_v31  ;;  %v1322_v38 = vmax.f32 %v873_v36, 0.0  ;;  %v1386_v39 = vmax.f32 %v1129_v37, 0.0 }
 0x176   : > { %1452 = vst [vmem:[%s2485_s17 + $0xb8] sm:$0xff] %v1324_v34  ;;  %1516 = vst [vmem:[%s2485_s17 + $0x2b8] sm:$0xff] %v1388_v35 }
 0x177   : > { %1450 = vst [vmem:[%s2485_s17 + $0xa8] sm:$0xff] %v1322_v38  ;;  %1514 = vst [vmem:[%s2485_s17 + $0x2a8] sm:$0xff] %v1386_v39 }
 0x179   : > { %v1858_v40 = vpop.f32.mrb[24].mxu0  ;;  %v1922_v41 = vpop.f32.mrb[24].mxu1 }
 0x17a   : > { %v1327_v42 = vmax.f32 %v1858_v40, 0.0  ;;  %v1391_v43 = vmax.f32 %v1922_v41, 0.0  ;;  %v886_v44 = vpop.f32.mrb[25].mxu0  ;;  %v1142_v45 = vpop.f32.mrb[25].mxu1 }
 0x17b   : > { %v1325_v46 = vmax.f32 %v886_v44, 0.0  ;;  %v1389_v47 = vmax.f32 %v1142_v45, 0.0  ;;  %v1859_v48 = vpop.f32.mrb[26].mxu0  ;;  %v1923_v49 = vpop.f32.mrb[26].mxu1 }
 0x17c   : > { %1455 = vst [vmem:[%s2485_s17 + $0xd0] sm:$0xff] %v1327_v42  ;;  %1519 = vst [vmem:[%s2485_s17 + $0x2d0] sm:$0xff] %v1391_v43  ;;  %v1328_v50 = vmax.f32 %v1859_v48, 0.0  ;;  %v1392_v51 = vmax.f32 %v1923_v49, 0.0  ;;  %v889_v52 = vpop.f32.mrb[27].mxu0  ;;  %v1145_v53 = vpop.f32.mrb[27].mxu1 }
 0x17d   : > { %1453 = vst [vmem:[%s2485_s17 + $0xc0] sm:$0xff] %v1325_v46  ;;  %1517 = vst [vmem:[%s2485_s17 + $0x2c0] sm:$0xff] %v1389_v47  ;;  %v1326_v54 = vmax.f32 %v889_v52, 0.0  ;;  %v1390_v55 = vmax.f32 %v1145_v53, 0.0 }
 0x17e   : > { %1456 = vst [vmem:[%s2485_s17 + $0xd8] sm:$0xff] %v1328_v50  ;;  %1520 = vst [vmem:[%s2485_s17 + $0x2d8] sm:$0xff] %v1392_v51 }
 0x17f   : > { %1454 = vst [vmem:[%s2485_s17 + $0xc8] sm:$0xff] %v1326_v54  ;;  %1518 = vst [vmem:[%s2485_s17 + $0x2c8] sm:$0xff] %v1390_v55 }
 0x181   : > { %v1862_v56 = vpop.f32.mrb[28].mxu0  ;;  %v1926_v57 = vpop.f32.mrb[28].mxu1 }
 0x182   : > { %v1331_v58 = vmax.f32 %v1862_v56, 0.0  ;;  %v1395_v59 = vmax.f32 %v1926_v57, 0.0  ;;  %v902_v60 = vpop.f32.mrb[29].mxu0  ;;  %v1158_v61 = vpop.f32.mrb[29].mxu1 }
 0x183   : > { %v1329_v62 = vmax.f32 %v902_v60, 0.0  ;;  %v1393_v63 = vmax.f32 %v1158_v61, 0.0  ;;  %v1863_v0 = vpop.f32.mrb[30].mxu0  ;;  %v1927_v1 = vpop.f32.mrb[30].mxu1 }
 0x184   : > { %1459 = vst [vmem:[%s2485_s17 + $0xf0] sm:$0xff] %v1331_v58  ;;  %1523 = vst [vmem:[%s2485_s17 + $0x2f0] sm:$0xff] %v1395_v59  ;;  %v1332_v2 = vmax.f32 %v1863_v0, 0.0  ;;  %v1396_v3 = vmax.f32 %v1927_v1, 0.0  ;;  %v905_v4 = vpop.f32.mrb[31].mxu0  ;;  %v1161_v5 = vpop.f32.mrb[31].mxu1 }
 0x185   : > { %1457 = vst [vmem:[%s2485_s17 + $0xe0] sm:$0xff] %v1329_v62  ;;  %1521 = vst [vmem:[%s2485_s17 + $0x2e0] sm:$0xff] %v1393_v63  ;;  %v1330_v6 = vmax.f32 %v905_v4, 0.0  ;;  %v1394_v7 = vmax.f32 %v1161_v5, 0.0 }
 0x186   : > { %1460 = vst [vmem:[%s2485_s17 + $0xf8] sm:$0xff] %v1332_v2  ;;  %1524 = vst [vmem:[%s2485_s17 + $0x2f8] sm:$0xff] %v1396_v3 }
 0x187   : > { %1458 = vst [vmem:[%s2485_s17 + $0xe8] sm:$0xff] %v1330_v6  ;;  %1522 = vst [vmem:[%s2485_s17 + $0x2e8] sm:$0xff] %v1394_v7 }
 0x189   : > { %v1866_v8 = vpop.f32.mrb[32].mxu0  ;;  %v1930_v9 = vpop.f32.mrb[32].mxu1 }
 0x18a   : > { %v1335_v10 = vmax.f32 %v1866_v8, 0.0  ;;  %v1399_v11 = vmax.f32 %v1930_v9, 0.0  ;;  %v918_v12 = vpop.f32.mrb[33].mxu0  ;;  %v1174_v13 = vpop.f32.mrb[33].mxu1 }
 0x18b   : > { %v1333_v14 = vmax.f32 %v918_v12, 0.0  ;;  %v1397_v15 = vmax.f32 %v1174_v13, 0.0  ;;  %v1867_v16 = vpop.f32.mrb[34].mxu0  ;;  %v1931_v17 = vpop.f32.mrb[34].mxu1 }
 0x18c   : > { %1463 = vst [vmem:[%s2485_s17 + $0x110] sm:$0xff] %v1335_v10  ;;  %1527 = vst [vmem:[%s2485_s17 + $0x310] sm:$0xff] %v1399_v11  ;;  %v1336_v18 = vmax.f32 %v1867_v16, 0.0  ;;  %v1400_v19 = vmax.f32 %v1931_v17, 0.0  ;;  %v921_v20 = vpop.f32.mrb[35].mxu0  ;;  %v1177_v21 = vpop.f32.mrb[35].mxu1 }
 0x18d   : > { %1461 = vst [vmem:[%s2485_s17 + $0x100] sm:$0xff] %v1333_v14  ;;  %1525 = vst [vmem:[%s2485_s17 + $0x300] sm:$0xff] %v1397_v15  ;;  %v1334_v22 = vmax.f32 %v921_v20, 0.0  ;;  %v1398_v23 = vmax.f32 %v1177_v21, 0.0 }
 0x18e   : > { %1464 = vst [vmem:[%s2485_s17 + $0x118] sm:$0xff] %v1336_v18  ;;  %1528 = vst [vmem:[%s2485_s17 + $0x318] sm:$0xff] %v1400_v19 }
 0x18f   : > { %1462 = vst [vmem:[%s2485_s17 + $0x108] sm:$0xff] %v1334_v22  ;;  %1526 = vst [vmem:[%s2485_s17 + $0x308] sm:$0xff] %v1398_v23 }
 0x191   : > { %v1870_v24 = vpop.f32.mrb[36].mxu0  ;;  %v1934_v25 = vpop.f32.mrb[36].mxu1 }
 0x192   : > { %v1339_v26 = vmax.f32 %v1870_v24, 0.0  ;;  %v1403_v27 = vmax.f32 %v1934_v25, 0.0  ;;  %v934_v28 = vpop.f32.mrb[37].mxu0  ;;  %v1190_v29 = vpop.f32.mrb[37].mxu1 }
 0x193   : > { %v1337_v30 = vmax.f32 %v934_v28, 0.0  ;;  %v1401_v31 = vmax.f32 %v1190_v29, 0.0  ;;  %v1871_v32 = vpop.f32.mrb[38].mxu0  ;;  %v1935_v33 = vpop.f32.mrb[38].mxu1 }
 0x194   : > { %1467 = vst [vmem:[%s2485_s17 + $0x130] sm:$0xff] %v1339_v26  ;;  %1531 = vst [vmem:[%s2485_s17 + $0x330] sm:$0xff] %v1403_v27  ;;  %v1340_v34 = vmax.f32 %v1871_v32, 0.0  ;;  %v1404_v35 = vmax.f32 %v1935_v33, 0.0  ;;  %v937_v36 = vpop.f32.mrb[39].mxu0  ;;  %v1193_v37 = vpop.f32.mrb[39].mxu1 }
 0x195   : > { %1465 = vst [vmem:[%s2485_s17 + $0x120] sm:$0xff] %v1337_v30  ;;  %1529 = vst [vmem:[%s2485_s17 + $0x320] sm:$0xff] %v1401_v31  ;;  %v1338_v38 = vmax.f32 %v937_v36, 0.0  ;;  %v1402_v39 = vmax.f32 %v1193_v37, 0.0 }
 0x196   : > { %1468 = vst [vmem:[%s2485_s17 + $0x138] sm:$0xff] %v1340_v34  ;;  %1532 = vst [vmem:[%s2485_s17 + $0x338] sm:$0xff] %v1404_v35 }
 0x197   : > { %1466 = vst [vmem:[%s2485_s17 + $0x128] sm:$0xff] %v1338_v38  ;;  %1530 = vst [vmem:[%s2485_s17 + $0x328] sm:$0xff] %v1402_v39 }
 0x199   : > { %v1874_v40 = vpop.f32.mrb[40].mxu0  ;;  %v1938_v41 = vpop.f32.mrb[40].mxu1 }
 0x19a   : > { %v1343_v42 = vmax.f32 %v1874_v40, 0.0  ;;  %v1407_v43 = vmax.f32 %v1938_v41, 0.0  ;;  %v950_v44 = vpop.f32.mrb[41].mxu0  ;;  %v1206_v45 = vpop.f32.mrb[41].mxu1 }
 0x19b   : > { %v1341_v46 = vmax.f32 %v950_v44, 0.0  ;;  %v1405_v47 = vmax.f32 %v1206_v45, 0.0  ;;  %v1875_v48 = vpop.f32.mrb[42].mxu0  ;;  %v1939_v49 = vpop.f32.mrb[42].mxu1 }
 0x19c   : > { %1471 = vst [vmem:[%s2485_s17 + $0x150] sm:$0xff] %v1343_v42  ;;  %1535 = vst [vmem:[%s2485_s17 + $0x350] sm:$0xff] %v1407_v43  ;;  %v1344_v50 = vmax.f32 %v1875_v48, 0.0  ;;  %v1408_v51 = vmax.f32 %v1939_v49, 0.0  ;;  %v953_v52 = vpop.f32.mrb[43].mxu0  ;;  %v1209_v53 = vpop.f32.mrb[43].mxu1 }
 0x19d   : > { %1469 = vst [vmem:[%s2485_s17 + $0x140] sm:$0xff] %v1341_v46  ;;  %1533 = vst [vmem:[%s2485_s17 + $0x340] sm:$0xff] %v1405_v47  ;;  %v1342_v54 = vmax.f32 %v953_v52, 0.0  ;;  %v1406_v55 = vmax.f32 %v1209_v53, 0.0 }
 0x19e   : > { %1472 = vst [vmem:[%s2485_s17 + $0x158] sm:$0xff] %v1344_v50  ;;  %1536 = vst [vmem:[%s2485_s17 + $0x358] sm:$0xff] %v1408_v51 }
 0x19f   : > { %1470 = vst [vmem:[%s2485_s17 + $0x148] sm:$0xff] %v1342_v54  ;;  %1534 = vst [vmem:[%s2485_s17 + $0x348] sm:$0xff] %v1406_v55 }
 0x1a1   : > { %v1878_v56 = vpop.f32.mrb[44].mxu0  ;;  %v1942_v57 = vpop.f32.mrb[44].mxu1 }
 0x1a2   : > { %v1347_v58 = vmax.f32 %v1878_v56, 0.0  ;;  %v1411_v59 = vmax.f32 %v1942_v57, 0.0  ;;  %v966_v60 = vpop.f32.mrb[45].mxu0  ;;  %v1222_v61 = vpop.f32.mrb[45].mxu1 }
 0x1a3   : > { %v1345_v62 = vmax.f32 %v966_v60, 0.0  ;;  %v1409_v63 = vmax.f32 %v1222_v61, 0.0  ;;  %v1879_v0 = vpop.f32.mrb[46].mxu0  ;;  %v1943_v1 = vpop.f32.mrb[46].mxu1 }
 0x1a4   : > { %1475 = vst [vmem:[%s2485_s17 + $0x170] sm:$0xff] %v1347_v58  ;;  %1539 = vst [vmem:[%s2485_s17 + $0x370] sm:$0xff] %v1411_v59  ;;  %v1348_v2 = vmax.f32 %v1879_v0, 0.0  ;;  %v1412_v3 = vmax.f32 %v1943_v1, 0.0  ;;  %v969_v4 = vpop.f32.mrb[47].mxu0  ;;  %v1225_v5 = vpop.f32.mrb[47].mxu1 }
 0x1a5   : > { %1473 = vst [vmem:[%s2485_s17 + $0x160] sm:$0xff] %v1345_v62  ;;  %1537 = vst [vmem:[%s2485_s17 + $0x360] sm:$0xff] %v1409_v63  ;;  %v1346_v6 = vmax.f32 %v969_v4, 0.0  ;;  %v1410_v7 = vmax.f32 %v1225_v5, 0.0 }
 0x1a6   : > { %1476 = vst [vmem:[%s2485_s17 + $0x178] sm:$0xff] %v1348_v2  ;;  %1540 = vst [vmem:[%s2485_s17 + $0x378] sm:$0xff] %v1412_v3 }
 0x1a7   : > { %1474 = vst [vmem:[%s2485_s17 + $0x168] sm:$0xff] %v1346_v6  ;;  %1538 = vst [vmem:[%s2485_s17 + $0x368] sm:$0xff] %v1410_v7 }
 0x1a9   : > { %v1882_v8 = vpop.f32.mrb[48].mxu0  ;;  %v1946_v9 = vpop.f32.mrb[48].mxu1 }
 0x1aa   : > { %v1351_v10 = vmax.f32 %v1882_v8, 0.0  ;;  %v1415_v11 = vmax.f32 %v1946_v9, 0.0  ;;  %v982_v12 = vpop.f32.mrb[49].mxu0  ;;  %v1238_v13 = vpop.f32.mrb[49].mxu1 }
 0x1ab   : > { %v1349_v14 = vmax.f32 %v982_v12, 0.0  ;;  %v1413_v15 = vmax.f32 %v1238_v13, 0.0  ;;  %v1883_v16 = vpop.f32.mrb[50].mxu0  ;;  %v1947_v17 = vpop.f32.mrb[50].mxu1 }
 0x1ac   : > { %1479 = vst [vmem:[%s2485_s17 + $0x190] sm:$0xff] %v1351_v10  ;;  %1543 = vst [vmem:[%s2485_s17 + $0x390] sm:$0xff] %v1415_v11  ;;  %v1352_v18 = vmax.f32 %v1883_v16, 0.0  ;;  %v1416_v19 = vmax.f32 %v1947_v17, 0.0  ;;  %v985_v20 = vpop.f32.mrb[51].mxu0  ;;  %v1241_v21 = vpop.f32.mrb[51].mxu1 }
 0x1ad   : > { %1477 = vst [vmem:[%s2485_s17 + $0x180] sm:$0xff] %v1349_v14  ;;  %1541 = vst [vmem:[%s2485_s17 + $0x380] sm:$0xff] %v1413_v15  ;;  %v1350_v22 = vmax.f32 %v985_v20, 0.0  ;;  %v1414_v23 = vmax.f32 %v1241_v21, 0.0 }
 0x1ae   : > { %1480 = vst [vmem:[%s2485_s17 + $0x198] sm:$0xff] %v1352_v18  ;;  %1544 = vst [vmem:[%s2485_s17 + $0x398] sm:$0xff] %v1416_v19 }
 0x1af   : > { %1478 = vst [vmem:[%s2485_s17 + $0x188] sm:$0xff] %v1350_v22  ;;  %1542 = vst [vmem:[%s2485_s17 + $0x388] sm:$0xff] %v1414_v23 }
 0x1b1   : > { %v1886_v24 = vpop.f32.mrb[52].mxu0  ;;  %v1950_v25 = vpop.f32.mrb[52].mxu1 }
 0x1b2   : > { %v1355_v26 = vmax.f32 %v1886_v24, 0.0  ;;  %v1419_v27 = vmax.f32 %v1950_v25, 0.0  ;;  %v998_v28 = vpop.f32.mrb[53].mxu0  ;;  %v1254_v29 = vpop.f32.mrb[53].mxu1 }
 0x1b3   : > { %v1353_v30 = vmax.f32 %v998_v28, 0.0  ;;  %v1417_v31 = vmax.f32 %v1254_v29, 0.0  ;;  %v1887_v32 = vpop.f32.mrb[54].mxu0  ;;  %v1951_v33 = vpop.f32.mrb[54].mxu1 }
 0x1b4   : > { %1483 = vst [vmem:[%s2485_s17 + $0x1b0] sm:$0xff] %v1355_v26  ;;  %1547 = vst [vmem:[%s2485_s17 + $0x3b0] sm:$0xff] %v1419_v27  ;;  %v1356_v34 = vmax.f32 %v1887_v32, 0.0  ;;  %v1420_v35 = vmax.f32 %v1951_v33, 0.0  ;;  %v1001_v36 = vpop.f32.mrb[55].mxu0  ;;  %v1257_v37 = vpop.f32.mrb[55].mxu1 }
 0x1b5   : > { %1481 = vst [vmem:[%s2485_s17 + $0x1a0] sm:$0xff] %v1353_v30  ;;  %1545 = vst [vmem:[%s2485_s17 + $0x3a0] sm:$0xff] %v1417_v31  ;;  %v1354_v38 = vmax.f32 %v1001_v36, 0.0  ;;  %v1418_v39 = vmax.f32 %v1257_v37, 0.0 }
 0x1b6   : > { %1484 = vst [vmem:[%s2485_s17 + $0x1b8] sm:$0xff] %v1356_v34  ;;  %1548 = vst [vmem:[%s2485_s17 + $0x3b8] sm:$0xff] %v1420_v35 }
 0x1b7   : > { %1482 = vst [vmem:[%s2485_s17 + $0x1a8] sm:$0xff] %v1354_v38  ;;  %1546 = vst [vmem:[%s2485_s17 + $0x3a8] sm:$0xff] %v1418_v39 }
 0x1b9   : > { %v1890_v40 = vpop.f32.mrb[56].mxu0  ;;  %v1954_v41 = vpop.f32.mrb[56].mxu1 }
 0x1ba   : > { %v1359_v42 = vmax.f32 %v1890_v40, 0.0  ;;  %v1423_v43 = vmax.f32 %v1954_v41, 0.0  ;;  %v1014_v44 = vpop.f32.mrb[57].mxu0  ;;  %v1270_v45 = vpop.f32.mrb[57].mxu1 }
 0x1bb   : > { %v1357_v46 = vmax.f32 %v1014_v44, 0.0  ;;  %v1421_v47 = vmax.f32 %v1270_v45, 0.0  ;;  %v1891_v48 = vpop.f32.mrb[58].mxu0  ;;  %v1955_v49 = vpop.f32.mrb[58].mxu1 }
 0x1bc   : > { %1487 = vst [vmem:[%s2485_s17 + $0x1d0] sm:$0xff] %v1359_v42  ;;  %1551 = vst [vmem:[%s2485_s17 + $0x3d0] sm:$0xff] %v1423_v43  ;;  %v1360_v50 = vmax.f32 %v1891_v48, 0.0  ;;  %v1424_v51 = vmax.f32 %v1955_v49, 0.0  ;;  %v1017_v52 = vpop.f32.mrb[59].mxu0  ;;  %v1273_v53 = vpop.f32.mrb[59].mxu1 }
 0x1bd   : > { %1485 = vst [vmem:[%s2485_s17 + $0x1c0] sm:$0xff] %v1357_v46  ;;  %1549 = vst [vmem:[%s2485_s17 + $0x3c0] sm:$0xff] %v1421_v47  ;;  %v1358_v54 = vmax.f32 %v1017_v52, 0.0  ;;  %v1422_v55 = vmax.f32 %v1273_v53, 0.0 }
 0x1be   : > { %1488 = vst [vmem:[%s2485_s17 + $0x1d8] sm:$0xff] %v1360_v50  ;;  %1552 = vst [vmem:[%s2485_s17 + $0x3d8] sm:$0xff] %v1424_v51 }
 0x1bf   : > { %1486 = vst [vmem:[%s2485_s17 + $0x1c8] sm:$0xff] %v1358_v54  ;;  %1550 = vst [vmem:[%s2485_s17 + $0x3c8] sm:$0xff] %v1422_v55 }
 0x1c1   : > { %v1894_v56 = vpop.f32.mrb[60].mxu0  ;;  %v1958_v57 = vpop.f32.mrb[60].mxu1 }
 0x1c2   : > { %v1363_v58 = vmax.f32 %v1894_v56, 0.0  ;;  %v1427_v59 = vmax.f32 %v1958_v57, 0.0  ;;  %v1030_v60 = vpop.f32.mrb[61].mxu0  ;;  %v1286_v61 = vpop.f32.mrb[61].mxu1 }
 0x1c3   : > { %v1361_v62 = vmax.f32 %v1030_v60, 0.0  ;;  %v1425_v63 = vmax.f32 %v1286_v61, 0.0  ;;  %v1895_v0 = vpop.f32.mrb[62].mxu0  ;;  %v1959_v1 = vpop.f32.mrb[62].mxu1 }
 0x1c4   : > { %1491 = vst [vmem:[%s2485_s17 + $0x1f0] sm:$0xff] %v1363_v58  ;;  %1555 = vst [vmem:[%s2485_s17 + $0x3f0] sm:$0xff] %v1427_v59  ;;  %v1364_v2 = vmax.f32 %v1895_v0, 0.0  ;;  %v1428_v3 = vmax.f32 %v1959_v1, 0.0  ;;  %v1033_v4 = vpop.f32.mrb[63].mxu0  ;;  %v1289_v5 = vpop.f32.mrb[63].mxu1 }
 0x1c5   : > { %1489 = vst [vmem:[%s2485_s17 + $0x1e0] sm:$0xff] %v1361_v62  ;;  %1553 = vst [vmem:[%s2485_s17 + $0x3e0] sm:$0xff] %v1425_v63  ;;  %v1362_v6 = vmax.f32 %v1033_v4, 0.0  ;;  %v1426_v7 = vmax.f32 %v1289_v5, 0.0 }
 0x1c6   : > { %1492 = vst [vmem:[%s2485_s17 + $0x1f8] sm:$0xff] %v1364_v2  ;;  %1556 = vst [vmem:[%s2485_s17 + $0x3f8] sm:$0xff] %v1428_v3 }
 0x1c7   : > { %1490 = vst [vmem:[%s2485_s17 + $0x1e8] sm:$0xff] %v1362_v6  ;;  %1554 = vst [vmem:[%s2485_s17 + $0x3e8] sm:$0xff] %v1426_v7 }
 0x1c8   : > { %2180 = shalt.err (!%p2177_p7)
}
 0x1c9   : > { %s2181_s18 = scalar_lea.hbm %s2614_s22, 16384  ;;  %s2185_s26 = scalar_lea.hbm %s2668_s2, 32768 }
 0x1ca   : > { %p2182_p9 = scmp.ne.s32.totalorder %s2614_s22, %s2181_s18  ;;  %p2186_p5 = scmp.lt.u32.totalorder %s2614_s22, %s2668_s2 }
 0x1cb   : > { %p2187_p11 = scmp.lt.u32.totalorder %s2185_s26, %s2181_s18  ;;  %p2189_p4 = scmp.lt.u32.totalorder %s2181_s18, %s2614_s22 }
 0x1cc   : > { %p2183_p1 = pnand %p2182_p9, %p2355_p12 }
 0x1cd   : > { %p2188_p2 = por %p2187_p11, %p2186_p5 }
 0x1ce   : > { %p2184_p0 = pneg %p2183_p1 }
 0x1cf   : > { %p2190_p6 = por %p2189_p4, %p2188_p2 }
 0x1d1   : > { %p2191_p8 = pnand %p2190_p6, %p2184_p0 }
 0x1d3   : > { %2194 = shalt.err (!%p2191_p8)
}
 0x1d4   : > { %s2244_s3 = smov 128   ;;  %s2245_s15 = smov 8  }
 0x1d5   : > { %1982 = dma.vmem_to_hbm [thread:$0]  (%p2355_p12), %s2616_s5, 16384, %s2614_s22, %s1558_s23, %s2244_s3, %s2244_s3, %s2245_s15  }
 0x1d6 PF: > { %s1586_s17 = sand.u32 1, %s2225_s9   ;;  %p2683_p10 = scmp.ne.s32.totalorder %s2673_s16, 0 }
 0x1d7   : > { %p2684_p13 = scmp.ge.s32.totalorder %s2237_s12, 2  ;;  %s1587_s4 = scalar_lea.sflag [#allocation4], %s1586_s17 }
 0x1d9   : > { %p1993_p3 = pnand %p2684_p13, %p2683_p10 }
 0x1db   : > { %2220 = dma.done.wait (!%p1993_p3), %s1587_s4, 16384  }
 0x1dc   : > { %2222 = vsyncadd (!%p1993_p3), %s1587_s4, 4294950912  ;;  %p16_p7 = scmp.ge.s32.totalorder %s2317_s21, 4   ;;  %s2685_s9 = smov %s2229_s10 }
 0x1dd   : > { %s2686_s10 = smov %s2233_s11  ;;  %s2687_s11 = smov %s2351_s8 }
 0x1de   : > { %s2688_s12 = smov %s2317_s21  ;;  %18 = sbr.rel (!%p16_p7) target bundleno = 6 (0x6), region = 77 }
 0x1e5   :  { %1592 = vsyncpa [#allocation3], 1 }
 0x1e6   :  { %1594 = vsyncpa [#allocation3 + $0x1], 1 }
 0x1e7   :  { %1595 = vsyncpa [#allocation6], 1 }
 0x1e8   :  { %1596 = vsyncpa [#allocation4], 1 }
 0x1e9   :  { %1598 = vsyncpa [#allocation4 + $0x1], 1 }

</bundles_post_ra>
